<compile_context>
chip_gen: v5e
topology: v5e:2x2
jax: 0.10.0
libtpu: 0.0.40
codegen_flags: <defaults>
</compile_context>

<pallas_src>
import functools

import jax
import jax.numpy as jnp
from jax import lax
from jax.experimental import pallas as pl
from jax.experimental.pallas import tpu as pltpu


def _round_up(x, m):
    return (x + m - 1) // m * m


# ----------------------------------------------------------------------------- kernel
def dkt_chunk_kernel(x_ref,                     # (C, Bb, 2Tp) f32: [v | v*(s>0.5)] per step
                     h0_ref,                    # (Bb, Tp) f32: initial hidden state
                     wx_ref, wh_ref,            # (2Tp, 3Tp), (Tp, 3Tp): packed GRU weights
                     b_ref,                     # (2, 3Tp) f32: [b_ih; b_hh]
                     wsc_ref,                   # (3, Tp)  f32: [w_sc(h); w_sc(v); b_sc@lane0]
                     score_ref,                 # (C, Bb, Tp) f32: un-reduced score partials
                     h_ref,                     # (Bb, Tp) f32: VMEM-resident hidden state
                     *, seq_len):
    c = pl.program_id(1)                        # time-chunk index ("arbitrary" axis)
    C = x_ref.shape[0]
    Tp = h_ref.shape[-1]

    @pl.when(c == 0)
    def _init():
        h_ref[...] = h0_ref[...]                # load the initial student state once

    base = c * C

    def step(i, carry):
        h = h_ref[...]                          # (Bb, Tp)  PRE-update hidden state
        x = x_ref[i]                            # (Bb, 2Tp) = [v | v * (s > 0.5)]
        v = x[:, :Tp]

        # ---- score head (pre-update h): pure VPU, un-reduced partial row.
        # The lane sum is done once in the wrapper; the bias sits in lane 0 of row 2.
        score_ref[i] = h * wsc_ref[0:1, :] + v * wsc_ref[1:2, :] + wsc_ref[2:3, :]

        # ---- GRU step: two MXU pushes with a real M (= batch block) dimension.
        # TODO(synk): for v6e/v7x, pltpu.matmul_push_rhs/acc_lhs/pop could keep the
        # (few-tile) padded weights staged in the MXU across the inner time loop.
        gi = jnp.dot(x.astype(wx_ref.dtype), wx_ref[...],
                     preferred_element_type=jnp.float32) + b_ref[0:1, :]
        gh = jnp.dot(h.astype(wh_ref.dtype), wh_ref[...],
                     preferred_element_type=jnp.float32) + b_ref[1:2, :]

        # Lane-aligned gate slices (each gate block starts at a multiple of 128).
        i_r, i_z, i_n = gi[:, :Tp], gi[:, Tp:2 * Tp], gi[:, 2 * Tp:]
        h_r, h_z, h_n = gh[:, :Tp], gh[:, Tp:2 * Tp], gh[:, 2 * Tp:]
        r = jax.nn.sigmoid(i_r + h_r)
        z = jax.nn.sigmoid(i_z + h_z)
        n = jnp.tanh(i_n + r * h_n)
        h_new = (1.0 - z) * n + z * h

        # Freeze the state on padded tail timesteps (global t >= seq_len).
        m = ((base + i) < seq_len).astype(jnp.float32)
        h_ref[...] = m * h_new + (1.0 - m) * h
        return carry

    lax.fori_loop(0, C, step, 0)


# ----------------------------------------------------------------------------- params
def init_params(topic_size, key):
    """Deterministic synthetic parameters (same shapes/layout as the PyTorch module)."""
    T = topic_size
    ks = jax.random.split(key, 6)
    bound = 1.0 / jnp.sqrt(T)
    return {
        "topic_size": T,
        "w_ih": jax.random.uniform(ks[0], (3 * T, 2 * T), jnp.float32, -bound, bound),
        "w_hh": jax.random.uniform(ks[1], (3 * T, T), jnp.float32, -bound, bound),
        "b_ih": jax.random.uniform(ks[2], (3 * T,), jnp.float32, -bound, bound),
        "b_hh": jax.random.uniform(ks[3], (3 * T,), jnp.float32, -bound, bound),
        "w_score": jax.random.uniform(ks[4], (1, 2 * T), jnp.float32, -bound, bound),
        "b_score": jax.random.uniform(ks[5], (1,), jnp.float32, -bound, bound),
    }


def _pack_params(params, weights_dtype):
    """Pre-transpose, gate-pad (lane-align to 128) and fuse the PyTorch-layout weights."""
    T = params["topic_size"]
    Tp = _round_up(T, 128)
    w_ih, w_hh = params["w_ih"], params["w_hh"]
    b_ih, b_hh = params["b_ih"], params["b_hh"]

    W_x = jnp.zeros((2 * Tp, 3 * Tp), jnp.float32)      # acts on concat([v, v*gate])
    W_h = jnp.zeros((Tp, 3 * Tp), jnp.float32)          # acts on h
    B = jnp.zeros((2, 3 * Tp), jnp.float32)             # rows: b_ih, b_hh
    W_sc = jnp.zeros((3, Tp), jnp.float32)              # rows: w_sc(h), w_sc(v), b_sc

    for g in range(3):  # PyTorch GRU gate order: r, z, n
        rows = slice(g * T, (g + 1) * T)
        cols = slice(g * Tp, g * Tp + T)                 # gate block lane-aligned to 128
        W_x = W_x.at[0:T, cols].set(w_ih[rows, 0:T].T)            # v part
        W_x = W_x.at[Tp:Tp + T, cols].set(w_ih[rows, T:2 * T].T)  # v*gate part
        W_h = W_h.at[0:T, cols].set(w_hh[rows, :].T)
        B = B.at[0, cols].set(b_ih[rows])
        B = B.at[1, cols].set(b_hh[rows])

    W_sc = W_sc.at[0, :T].set(params["w_score"][0, :T])  # h part
    W_sc = W_sc.at[1, :T].set(params["w_score"][0, T:])  # v part
    W_sc = W_sc.at[2, 0].set(params["b_score"][0])        # bias -> counted once in lane sum

    return (W_x.astype(weights_dtype), W_h.astype(weights_dtype), B, W_sc, Tp)


# ----------------------------------------------------------------------------- fused forward
@functools.partial(jax.jit, static_argnames=("topic_size", "chunk", "batch_block"))
def _dkt_seq_batch(W_x, W_h, B_rows, W_sc, V, S, H0, *,
                   topic_size, chunk, batch_block):
    """Fused batched-sequence forward.  V:(B,L,T) f32, S:(B,L), H0:(B,T)."""
    T = topic_size
    Tp = W_h.shape[0]
    Bsz, L = V.shape[0], V.shape[1]

    C = max(1, min(chunk, L))                   # timesteps per grid step
    Lp = _round_up(L, C)
    bb = batch_block                            # sequences per batch block (sublane dim)
    Bp = _round_up(Bsz, bb)

    # Pack the streamed input as (time, batch, 2*Tp): per-step loads are full tiles.
    gate = (S > 0.5).astype(jnp.float32)
    X = jnp.zeros((Lp, Bp, 2 * Tp), jnp.float32)
    X = X.at[:L, :Bsz, :T].set(jnp.swapaxes(V, 0, 1))
    X = X.at[:L, :Bsz, Tp:Tp + T].set(jnp.swapaxes(V * gate[..., None], 0, 1))
    H0p = jnp.zeros((Bp, Tp), jnp.float32).at[:Bsz, :T].set(H0)

    kernel = functools.partial(dkt_chunk_kernel, seq_len=L)

    grid_spec = pltpu.PrefetchScalarGridSpec(
        num_scalar_prefetch=0,
        grid=(Bp // bb, Lp // C),
        in_specs=[
            pl.BlockSpec((C, bb, 2 * Tp), lambda b, c: (c, b, 0)),   # X chunk (streamed)
            pl.BlockSpec((bb, Tp), lambda b, c: (b, 0)),             # h0 (once per b block)
            pl.BlockSpec((2 * Tp, 3 * Tp), lambda b, c: (0, 0)),     # fused W_ih^T (once)
            pl.BlockSpec((Tp, 3 * Tp), lambda b, c: (0, 0)),         # W_hh^T (once)
            pl.BlockSpec((2, 3 * Tp), lambda b, c: (0, 0)),          # [b_ih; b_hh] (once)
            pl.BlockSpec((3, Tp), lambda b, c: (0, 0)),              # score weights+bias
        ],
        out_specs=(
            pl.BlockSpec((C, bb, Tp), lambda b, c: (c, b, 0)),       # score partial slab
            pl.BlockSpec((bb, Tp), lambda b, c: (b, 0)),             # resident hidden state
        ),
    )

    # Explicit VMEM budget (resident weights + double-buffered streamed blocks).
    wbytes = jnp.dtype(W_x.dtype).itemsize
    vmem_est = ((2 * Tp * 3 * Tp + Tp * 3 * Tp) * wbytes
                + (2 * 3 * Tp + 3 * Tp) * 4
                + 2 * (C * bb * 2 * Tp * 4)      # X chunks (double-buffered)
                + 2 * (C * bb * Tp * 4)          # score slab blocks (double-buffered)
                + 4 * (bb * Tp * 4))             # h0 + resident h
    vmem_limit = int(min(max(2 * vmem_est, 32 * 1024 * 1024), 64 * 1024 * 1024))
    # TODO(synk): for very large topic_size, tile the 3*Tp weight axis as an extra
    # "arbitrary" grid dimension (and use a per-chunk score scratch) to stay under
    # v7x's 64 MiB VMEM / v5e's 16 MiB scoped default.

    slab, h_out = pl.pallas_call(
        kernel,
        grid_spec=grid_spec,
        out_shape=(jax.ShapeDtypeStruct((Lp, Bp, Tp), jnp.float32),
                   jax.ShapeDtypeStruct((Bp, Tp), jnp.float32)),
        compiler_params=pltpu.CompilerParams(
            dimension_semantics=("parallel", "arbitrary"),
            vmem_limit_bytes=vmem_limit),
    )(X, H0p, W_x, W_h, B_rows, W_sc)

    scores = jnp.swapaxes(jnp.sum(slab, axis=-1), 0, 1)[:Bsz, :L]    # (B, L)
    h_final = h_out[:Bsz, :T]                                        # (B, T)
    return scores, h_final


class DKT:
    """Packs the PyTorch-layout DKT parameters once and serves fused Pallas forwards."""

    def __init__(self, params, *, weights_dtype=jnp.bfloat16, chunk=128, batch_block=8):
        self.topic_size = params["topic_size"]
        self.chunk = int(chunk)
        self.batch_block = int(batch_block)
        # Packing (transpose + lane-align + dtype cast) is done exactly ONCE here.
        self.W_x, self.W_h, self.B_rows, self.W_sc, self.Tp = _pack_params(
            params, weights_dtype)

    def forward_seq_batch(self, V, S, h0=None):
        """V: (B, L, T), S: (B, L) 0/1, h0: (B, T) or None -> (scores (B, L), h_final (B, T)).

        Row b equals the PyTorch module applied step-by-step to sequence b; the score
        at step t uses the pre-update hidden state, exactly as in DKTModel.forward."""
        T = self.topic_size
        V = jnp.asarray(V, jnp.float32)
        Bsz, L = V.shape[0], V.shape[1]
        S = jnp.asarray(S, jnp.float32).reshape(Bsz, L)
        if h0 is None:
            h0 = jnp.zeros((Bsz, T), jnp.float32)              # default_hidden() per row
        h0 = jnp.asarray(h0, jnp.float32).reshape(Bsz, T)
        return _dkt_seq_batch(self.W_x, self.W_h, self.B_rows, self.W_sc, V, S, h0,
                              topic_size=T, chunk=self.chunk,
                              batch_block=self.batch_block)

    def forward_seq(self, V, S, h=None):
        """Single sequence: V (L, T), S (L,), h (1,1,T) or None -> (scores (L,), h (1,1,T))."""
        T = self.topic_size
        h0 = None if h is None else jnp.asarray(h, jnp.float32).reshape(1, T)
        scores, h_final = self.forward_seq_batch(
            jnp.asarray(V, jnp.float32).reshape(1, -1, T),
            jnp.asarray(S, jnp.float32).reshape(1, -1), h0)
        return scores[0], h_final.reshape(1, 1, T)

    def forward(self, v, s, h=None):
        """Single step, matching DKTModel.forward: (v (T,), s, h) -> (score (1,), h' (1,1,T))."""
        T = self.topic_size
        scores, h_new = self.forward_seq(
            jnp.asarray(v, jnp.float32).reshape(1, T),
            jnp.asarray(s, jnp.float32).reshape(1), h)
        return scores.reshape(1), h_new


# ----------------------------------------------------------------------------- reference
def dkt_forward_ref(params, v, s, h=None):
    """Pure-JAX reference mirroring the PyTorch forward literally (single step)."""
    T = params["topic_size"]
    if h is None:
        h = jnp.zeros((1, 1, T), jnp.float32)
    hv = jnp.asarray(h, jnp.float32).reshape(-1)
    vv = jnp.asarray(v, jnp.float32).reshape(-1)
    score = params["w_score"] @ jnp.concatenate([hv, vv]) + params["b_score"]
    x = jnp.concatenate([vv, vv * (jnp.asarray(s) > 0.5).astype(jnp.float32)])
    gi = params["w_ih"] @ x + params["b_ih"]
    gh = params["w_hh"] @ hv + params["b_hh"]
    i_r, i_z, i_n = jnp.split(gi, 3)
    h_r, h_z, h_n = jnp.split(gh, 3)
    r = jax.nn.sigmoid(i_r + h_r)
    z = jax.nn.sigmoid(i_z + h_z)
    n = jnp.tanh(i_n + r * h_n)
    h_new = (1.0 - z) * n + z * hv
    return score.reshape(1), h_new.reshape(1, 1, T)


# ----------------------------------------------------------------------------- demo / check
if __name__ == "__main__":
    TOPIC_SIZE = 32
    SEQ_LEN = 9          # not a multiple of the f32 model's chunk -> exercises tail masking
    BATCH = 2

    key = jax.random.PRNGKey(0)
    kp, kv, ks = jax.random.split(key, 3)

    params = init_params(TOPIC_SIZE, kp)
    V = (jax.random.uniform(kv, (BATCH, SEQ_LEN, TOPIC_SIZE)) > 0.7).astype(jnp.float32)
    S = (jax.random.uniform(ks, (BATCH, SEQ_LEN)) > 0.5).astype(jnp.float32)

    # Pure-JAX reference: loop the literal per-step forward for every sequence.
    ref_scores, ref_h = [], []
    for b in range(BATCH):
        h_r = None
        sc_b = []
        for t in range(SEQ_LEN):
            sc, h_r = dkt_forward_ref(params, V[b, t], S[b, t], h_r)
            sc_b.append(sc[0])
        ref_scores.append(jnp.stack(sc_b))
        ref_h.append(h_r.reshape(-1))
    ref_scores = jnp.stack(ref_scores)           # (B, L)
    ref_h = jnp.stack(ref_h)                     # (B, T)

    # --- f32 weights: strict parity path; chunk=4 exercises multi-chunk residency + tail mask.
    model_f32 = DKT(params, weights_dtype=jnp.float32, chunk=4)
    scores, h_final = model_f32.forward_seq_batch(V, S)
    jax.block_until_ready((scores, h_final))
    assert scores.shape == (BATCH, SEQ_LEN) and h_final.shape == (BATCH, TOPIC_SIZE)
    assert jnp.allclose(scores, ref_scores, atol=1e-5, rtol=1e-5)
    assert jnp.allclose(h_final, ref_h, atol=1e-5, rtol=1e-5)

    # Single-step API parity with DKTModel.forward.
    sc1, h1 = model_f32.forward(V[0, 0], S[0, 0], None)
    sc1_ref, h1_ref = dkt_forward_ref(params, V[0, 0], S[0, 0], None)
    assert sc1.shape == (1,) and h1.shape == (1, 1, TOPIC_SIZE)
    assert jnp.allclose(sc1, sc1_ref, atol=1e-5, rtol=1e-5)
    assert jnp.allclose(h1, h1_ref, atol=1e-5, rtol=1e-5)

    # --- bf16 MXU weights (perf-recommended path; gate math / score head stay f32).
    model_bf16 = DKT(params, weights_dtype=jnp.bfloat16)   # default chunk=128 -> one chunk
    scores_bf, h_bf = model_bf16.forward_seq_batch(V, S)
    jax.block_until_ready((scores_bf, h_bf))
    assert jnp.allclose(scores_bf, ref_scores, atol=1e-1)  # loose tolerance for bf16 MXU
    assert jnp.allclose(h_bf, ref_h, atol=5e-2)

    print("KERNEL_OK")
</pallas_src>

<mosaic_0001>
module attributes {stable_mosaic.version = 11 : i64} {
  func.func @dkt_chunk_kernel(%arg0: i32, %arg1: i32, %arg2: memref<4x8x256xf32, #tpu.memory_space<vmem>>, %arg3: memref<8x128xf32, #tpu.memory_space<vmem>>, %arg4: memref<256x384xf32, #tpu.memory_space<vmem>>, %arg5: memref<128x384xf32, #tpu.memory_space<vmem>>, %arg6: memref<2x384xf32, #tpu.memory_space<vmem>>, %arg7: memref<3x128xf32, #tpu.memory_space<vmem>>, %arg8: memref<4x8x128xf32, #tpu.memory_space<vmem>>, %arg9: memref<8x128xf32, #tpu.memory_space<vmem>>) attributes {dimension_semantics = [#tpu.dimension_semantics<parallel>, #tpu.dimension_semantics<arbitrary>], iteration_bounds = array<i64: 1, 3>, scalar_prefetch = 0 : i64, scratch_operands = 0 : i64, tpu.core_type = #tpu.core_type<tc>, window_params = [{transform_indices = @transform_0, window_bounds = array<i64: 4, 8, 256>}, {transform_indices = @transform_1, window_bounds = array<i64: 8, 128>}, {pipeline_mode = #tpu.pipeline_mode<synchronous>, transform_indices = @transform_2, window_bounds = array<i64: 256, 384>}, {pipeline_mode = #tpu.pipeline_mode<synchronous>, transform_indices = @transform_3, window_bounds = array<i64: 128, 384>}, {pipeline_mode = #tpu.pipeline_mode<synchronous>, transform_indices = @transform_4, window_bounds = array<i64: 2, 384>}, {pipeline_mode = #tpu.pipeline_mode<synchronous>, transform_indices = @transform_5, window_bounds = array<i64: 3, 128>}, {transform_indices = @transform_6, window_bounds = array<i64: 4, 8, 128>}, {transform_indices = @transform_7, window_bounds = array<i64: 8, 128>}]} {
    %c0_i32 = arith.constant 0 : i32
    %0 = arith.cmpi eq, %arg1, %c0_i32 : i32
    %1 = arith.extui %0 : i1 to i32
    %c0_i32_0 = arith.constant 0 : i32
    %2 = arith.cmpi ne, %1, %c0_i32_0 : i32
    scf.if %2 {
      %c0 = arith.constant 0 : index
      %c0_4 = arith.constant 0 : index
      %5 = vector.load %arg3[%c0, %c0_4] : memref<8x128xf32, #tpu.memory_space<vmem>>, vector<8x128xf32>
      %c0_5 = arith.constant 0 : index
      %c0_6 = arith.constant 0 : index
      %6 = vector.load %arg9[%c0_5, %c0_6] : memref<8x128xf32, #tpu.memory_space<vmem>>, vector<8x128xf32>
      tpu.vector_store %arg9[%c0_5, %c0_6], %5 {strides = array<i32>} : memref<8x128xf32, #tpu.memory_space<vmem>>, vector<8x128xf32>,
    } else {
    }
    %c4_i32 = arith.constant 4 : i32
    %3 = arith.muli %arg1, %c4_i32 : i32
    %c0_i32_1 = arith.constant 0 : i32
    %c4_i32_2 = arith.constant 4 : i32
    %4 = arith.addi %c0_i32_1, %c4_i32_2 : i32
    %c1_i32 = arith.constant 1 : i32
    scf.for %arg10 = %c0_i32_1 to %4 step %c1_i32  : i32 {
      %c0 = arith.constant 0 : index
      %c0_4 = arith.constant 0 : index
      %5 = vector.load %arg9[%c0, %c0_4] : memref<8x128xf32, #tpu.memory_space<vmem>>, vector<8x128xf32>
      %6 = arith.index_cast %arg10 : i32 to index
      %c0_5 = arith.constant 0 : index
      %c0_6 = arith.constant 0 : index
      %7 = vector.load %arg2[%6, %c0_5, %c0_6] : memref<4x8x256xf32, #tpu.memory_space<vmem>>, vector<1x8x256xf32>
      %8 = vector.shape_cast %7 : vector<1x8x256xf32> to vector<8x256xf32>
      %9 = vector.extract_strided_slice %8 {offsets = [0, 0], sizes = [8, 128], strides = [1, 1]} : vector<8x256xf32> to vector<8x128xf32>
      %c0_7 = arith.constant 0 : index
      %c0_8 = arith.constant 0 : index
      %10 = vector.load %arg7[%c0_7, %c0_8] : memref<3x128xf32, #tpu.memory_space<vmem>>, vector<1x128xf32>
      %11 = vector.broadcast %10 : vector<1x128xf32> to vector<8x128xf32>
      %12 = arith.mulf %5, %11 : vector<8x128xf32>
      %c1 = arith.constant 1 : index
      %c0_9 = arith.constant 0 : index
      %13 = vector.load %arg7[%c1, %c0_9] : memref<3x128xf32, #tpu.memory_space<vmem>>, vector<1x128xf32>
      %14 = vector.broadcast %13 : vector<1x128xf32> to vector<8x128xf32>
      %15 = arith.mulf %9, %14 : vector<8x128xf32>
      %16 = arith.addf %12, %15 : vector<8x128xf32>
      %c2 = arith.constant 2 : index
      %c0_10 = arith.constant 0 : index
      %17 = vector.load %arg7[%c2, %c0_10] : memref<3x128xf32, #tpu.memory_space<vmem>>, vector<1x128xf32>
      %18 = vector.broadcast %17 : vector<1x128xf32> to vector<8x128xf32>
      %19 = arith.addf %16, %18 : vector<8x128xf32>
      %20 = arith.index_cast %arg10 : i32 to index
      %c0_11 = arith.constant 0 : index
      %c0_12 = arith.constant 0 : index
      %21 = vector.load %arg8[%20, %c0_11, %c0_12] : memref<4x8x128xf32, #tpu.memory_space<vmem>>, vector<1x8x128xf32>
      %22 = vector.shape_cast %21 : vector<1x8x128xf32> to vector<8x128xf32>
      %23 = vector.shape_cast %19 : vector<8x128xf32> to vector<1x8x128xf32>
      tpu.vector_store %arg8[%20, %c0_11, %c0_12], %23 {strides = array<i32>} : memref<4x8x128xf32, #tpu.memory_space<vmem>>, vector<1x8x128xf32>,
      %c0_13 = arith.constant 0 : index
      %c0_14 = arith.constant 0 : index
      %24 = vector.load %arg4[%c0_13, %c0_14] : memref<256x384xf32, #tpu.memory_space<vmem>>, vector<256x384xf32>
      %cst = arith.constant dense<0.000000e+00> : vector<8x384xf32>
      %25 = tpu.matmul %8, %24, %cst {dimension_numbers = #tpu.dot_dimension_numbers<[1], [0], [0], [1], [0, 0, 1, 1], [], []>} : vector<8x256xf32>, vector<256x384xf32>, vector<8x384xf32> -> vector<8x384xf32>
      %c0_15 = arith.constant 0 : index
      %c0_16 = arith.constant 0 : index
      %26 = vector.load %arg6[%c0_15, %c0_16] : memref<2x384xf32, #tpu.memory_space<vmem>>, vector<1x384xf32>
      %27 = vector.broadcast %26 : vector<1x384xf32> to vector<8x384xf32>
      %28 = arith.addf %25, %27 : vector<8x384xf32>
      %c0_17 = arith.constant 0 : index
      %c0_18 = arith.constant 0 : index
      %29 = vector.load %arg5[%c0_17, %c0_18] : memref<128x384xf32, #tpu.memory_space<vmem>>, vector<128x384xf32>
      %cst_19 = arith.constant dense<0.000000e+00> : vector<8x384xf32>
      %30 = tpu.matmul %5, %29, %cst_19 {dimension_numbers = #tpu.dot_dimension_numbers<[1], [0], [0], [1], [0, 0, 1, 1], [], []>} : vector<8x128xf32>, vector<128x384xf32>, vector<8x384xf32> -> vector<8x384xf32>
      %c1_20 = arith.constant 1 : index
      %c0_21 = arith.constant 0 : index
      %31 = vector.load %arg6[%c1_20, %c0_21] : memref<2x384xf32, #tpu.memory_space<vmem>>, vector<1x384xf32>
      %32 = vector.broadcast %31 : vector<1x384xf32> to vector<8x384xf32>
      %33 = arith.addf %30, %32 : vector<8x384xf32>
      %34 = vector.extract_strided_slice %28 {offsets = [0, 0], sizes = [8, 128], strides = [1, 1]} : vector<8x384xf32> to vector<8x128xf32>
      %35 = vector.extract_strided_slice %28 {offsets = [0, 128], sizes = [8, 128], strides = [1, 1]} : vector<8x384xf32> to vector<8x128xf32>
      %36 = vector.extract_strided_slice %28 {offsets = [0, 256], sizes = [8, 128], strides = [1, 1]} : vector<8x384xf32> to vector<8x128xf32>
      %37 = vector.extract_strided_slice %33 {offsets = [0, 0], sizes = [8, 128], strides = [1, 1]} : vector<8x384xf32> to vector<8x128xf32>
      %38 = vector.extract_strided_slice %33 {offsets = [0, 128], sizes = [8, 128], strides = [1, 1]} : vector<8x384xf32> to vector<8x128xf32>
      %39 = vector.extract_strided_slice %33 {offsets = [0, 256], sizes = [8, 128], strides = [1, 1]} : vector<8x384xf32> to vector<8x128xf32>
      %40 = arith.addf %34, %37 : vector<8x128xf32>
      %41 = arith.negf %40 : vector<8x128xf32>
      %42 = math.exp %41 : vector<8x128xf32>
      %cst_22 = arith.constant 1.000000e+00 : f32
      %43 = vector.broadcast %cst_22 : f32 to vector<8x128xf32>
      %44 = arith.addf %43, %42 : vector<8x128xf32>
      %45 = arith.divf %43, %44 : vector<8x128xf32>
      %46 = arith.addf %35, %38 : vector<8x128xf32>
      %47 = arith.negf %46 : vector<8x128xf32>
      %48 = math.exp %47 : vector<8x128xf32>
      %cst_23 = arith.constant 1.000000e+00 : f32
      %49 = vector.broadcast %cst_23 : f32 to vector<8x128xf32>
      %50 = arith.addf %49, %48 : vector<8x128xf32>
      %51 = arith.divf %49, %50 : vector<8x128xf32>
      %52 = arith.mulf %45, %39 : vector<8x128xf32>
      %53 = arith.addf %36, %52 : vector<8x128xf32>
      %54 = math.tanh %53 : vector<8x128xf32>
      %cst_24 = arith.constant 1.000000e+00 : f32
      %55 = vector.broadcast %cst_24 : f32 to vector<8x128xf32>
      %56 = arith.subf %55, %51 : vector<8x128xf32>
      %57 = arith.mulf %56, %54 : vector<8x128xf32>
      %58 = arith.mulf %51, %5 : vector<8x128xf32>
      %59 = arith.addf %57, %58 : vector<8x128xf32>
      %60 = arith.addi %3, %arg10 : i32
      %c9_i32 = arith.constant 9 : i32
      %61 = arith.cmpi slt, %60, %c9_i32 : i32
      %62 = arith.extui %61 : i1 to i32
      %63 = arith.sitofp %62 : i32 to f32
      %64 = vector.broadcast %63 : f32 to vector<8x128xf32>
      %65 = arith.mulf %64, %59 : vector<8x128xf32>
      %cst_25 = arith.constant 1.000000e+00 : f32
      %66 = arith.subf %cst_25, %63 : f32
      %67 = vector.broadcast %66 : f32 to vector<8x128xf32>
      %68 = arith.mulf %67, %5 : vector<8x128xf32>
      %69 = arith.addf %65, %68 : vector<8x128xf32>
      %c0_26 = arith.constant 0 : index
      %c0_27 = arith.constant 0 : index
      %70 = vector.load %arg9[%c0_26, %c0_27] : memref<8x128xf32, #tpu.memory_space<vmem>>, vector<8x128xf32>
      tpu.vector_store %arg9[%c0_26, %c0_27], %69 {strides = array<i32>} : memref<8x128xf32, #tpu.memory_space<vmem>>, vector<8x128xf32>,
    }
    %c4_i32_3 = arith.constant 4 : i32
    return
  }
  func.func @transform_0(%arg0: i32, %arg1: i32) -> (i32, i32, i32) {
    %c0_i32 = arith.constant 0 : i32
    %c0_i32_0 = arith.constant 0 : i32
    return %arg1, %arg0, %c0_i32 : i32, i32, i32
  }
  func.func @transform_1(%arg0: i32, %arg1: i32) -> (i32, i32) {
    %c0_i32 = arith.constant 0 : i32
    %c0_i32_0 = arith.constant 0 : i32
    return %arg0, %c0_i32 : i32, i32
  }
  func.func @transform_2(%arg0: i32, %arg1: i32) -> (i32, i32) {
    %c0_i32 = arith.constant 0 : i32
    %c0_i32_0 = arith.constant 0 : i32
    %c0_i32_1 = arith.constant 0 : i32
    return %c0_i32, %c0_i32_0 : i32, i32
  }
  func.func @transform_3(%arg0: i32, %arg1: i32) -> (i32, i32) {
    %c0_i32 = arith.constant 0 : i32
    %c0_i32_0 = arith.constant 0 : i32
    %c0_i32_1 = arith.constant 0 : i32
    return %c0_i32, %c0_i32_0 : i32, i32
  }
  func.func @transform_4(%arg0: i32, %arg1: i32) -> (i32, i32) {
    %c0_i32 = arith.constant 0 : i32
    %c0_i32_0 = arith.constant 0 : i32
    %c0_i32_1 = arith.constant 0 : i32
    return %c0_i32, %c0_i32_0 : i32, i32
  }
  func.func @transform_5(%arg0: i32, %arg1: i32) -> (i32, i32) {
    %c0_i32 = arith.constant 0 : i32
    %c0_i32_0 = arith.constant 0 : i32
    %c0_i32_1 = arith.constant 0 : i32
    return %c0_i32, %c0_i32_0 : i32, i32
  }
  func.func @transform_6(%arg0: i32, %arg1: i32) -> (i32, i32, i32) {
    %c0_i32 = arith.constant 0 : i32
    %c0_i32_0 = arith.constant 0 : i32
    return %arg1, %arg0, %c0_i32 : i32, i32, i32
  }
  func.func @transform_7(%arg0: i32, %arg1: i32) -> (i32, i32) {
    %c0_i32 = arith.constant 0 : i32
    %c0_i32_0 = arith.constant 0 : i32
    return %arg0, %c0_i32 : i32, i32
  }
}

</mosaic_0001>

<bundles_post_ra>
// kernel: _dkt_seq_batch.1
= control target key start
LH: loop header
LB: loop body
LE: loop exit
PB: predicated region body
PF: predicated region fallthrough
CT: control target
= control target key end

     0   :  { %13 = vsyncpa [#allocation3], 0  ;;  %s1354_s0 = inlined_call_operand.vmem [shape: f32[12,8,256], index: 0, kind: input, shape index: {}]   ;;  %s1355_s1 = inlined_call_operand.vmem [shape: f32[8,128], index: 1, kind: input, shape index: {}]   ;;  %s1356_s2 = inlined_call_operand.hbm [shape: f32[256,384], index: 2, kind: input, shape index: {}]   ;;  %s1357_s3 = inlined_call_operand.hbm [shape: f32[128,384], index: 3, kind: input, shape index: {}]   ;;  %s1358_s4 = inlined_call_operand.vmem [shape: f32[2,384], index: 4, kind: input, shape index: {}]   ;;  %s1359_s5 = inlined_call_operand.vmem [shape: f32[3,128], index: 5, kind: input, shape index: {}]   ;;  %s1360_s6 = inlined_call_operand.vmem [shape: f32[12,8,128], index: 6, kind: output, shape index: {0}]   ;;  %s1361_s7 = inlined_call_operand.vmem [shape: f32[8,128], index: 7, kind: output, shape index: {1}]  }
   0x1   :  { %14 = vsyncpa [#allocation5], 0  ;;  %s1210_s24 = smov 0   ;;  %s1212_s25 = smov 0  }
   0x2   :  { %s1214_s26 = smov 0  }
   0x3 LB: > { %s970_s27 = sadd.s32 4294967295, %s1160_s26   ;;  %s29_s28 = sadd.s32 1, %s1156_s25  ;;  %s1160_s26 = sphi %s1214_s26, %s20_s26   ;;  %s1156_s25 = sphi %s1212_s25, %s1366_s25   ;;  %s1152_s24 = sphi %s1210_s24, %s1365_s24  }
   0x4   : > { %p30_p0 = scmp.ge.s32.totalorder %s29_s28, 3  ;;  %p972_p1 = scmp.ge.s32.totalorder %s1160_s26, 1 }
   0x5   : > { %p229_p2 = scmp.lt.s32.totalorder %s1160_s26, 4  ;;  %p1235_p4 = scmp.eq.s32.totalorder %s970_s27, 0 }
   0x6   : > { %s1368_s28 = smov (%p30_p0, %s29_s28), 0  ;;  %s247_s10 = sshll.u32 %s1356_s2, 4  ;;  %s248_s10 = int_to_ptr.hbm [resolvable:$true] %s247_s10 }
   0x7   : > { %p1231_p3 = pnand %p972_p1, %p229_p2  ;;  %s1166_s11 = smov [#allocation2]  }
   0x8   : > { %s249_s12 = sshll.u32 %s1166_s11, 4  ;;  %s261_s15 = sshll.u32 %s1357_s3, 4  ;;  %s250_s12 = int_to_ptr.vmem [resolvable:$true] %s249_s12  ;;  %s262_s15 = int_to_ptr.hbm [resolvable:$true] %s261_s15 }
   0x9   : > { %p1006_p5 = pneg %p1231_p3  ;;  %s1167_s16 = smov 384  }
   0xa   : > { %s1168_s17 = smov 24   ;;  %s1169_s18 = smov [#allocation4]  }
   0xb   : > { %p1007_p6 = pnand %p1235_p4, %p1006_p5  ;;  %s263_s19 = sshll.u32 %s1169_s18, 4  ;;  %s264_s19 = int_to_ptr.vmem [resolvable:$true] %s263_s19 }
   0xc   : > { %299 = sbr.rel (%p1231_p3) target bundleno = 278 (0x116), region = 44 }
   0xd   : > { %1009 = dma.hbm_to_vmem [thread:$0]  (!%p1007_p6), %s248_s10, 12288, %s250_s12, [#allocation3], %s1167_s16, %s1167_s16, %s1168_s17  }
   0xe   : > { %1012 = dma.hbm_to_vmem [thread:$0]  (!%p1007_p6), %s262_s15, 6144, %s264_s19, [#allocation5], %s1167_s16, %s1167_s16, %s1168_s17  }
  0x11   : > { %1143 = dma.done.wait (%p1235_p4), [#allocation3], 12288  }
  0x12   : > { %1145 = vsyncadd (%p1235_p4), [#allocation3], 4294955008 }
  0x13   : > { %1147 = dma.done.wait (%p1235_p4), [#allocation5], 6144  }
  0x14   : > { %1149 = vsyncadd (%p1235_p4), [#allocation5], 4294961152  ;;  %s1260_s20 = sshll.u32 %s1152_s24, 2  ;;  %p985_p8 = scmp.ne.s32.totalorder %s1152_s24, 0 }
  0x15   : > { %p354_p7 = scmp.lt.s32.totalorder %s1260_s20, 11 }
  0x16   : > { %384 = sbr.rel (%p985_p8) target bundleno = 29 (0x1d), region = 56 }
  0x17   : > { %s355_s21 = scalar_select %p354_p7, %s1260_s20, 11 }
  0x19   : > { %s996_s22 = sshll.u32 %s355_s21, 4  ;;  %s984_s23 = sshll.u32 %s355_s21, 3 }
  0x1a   : > { %s1267_s8 = scalar_lea.vmem %s1354_s0, %s996_s22  ;;  %s1272_s11 = scalar_lea.vmem %s1360_s6, %s984_s23 }
  0x1b   : > { %v385_v0 = vld [vmem:[%s1355_s1] sm:$0xff] }
  0x1c   : > { %386 = vst [vmem:[%s1361_s7] sm:$0xff] %v385_v0 }
  0x1d PF: > { %s1281_s15 = smov 0  }
  0x1e LB: >> { %v459_v1 = vld [vmem:[#allocation2 + $0x170] sm:$0xff]  ;;  %v456_v3 = vld [vmem:[#allocation2 + $0x158] sm:$0xff]  ;;  %v453_v5 = vld [vmem:[#allocation2 + $0x140] sm:$0xff]  ;;  %s997_s24 = sshll.u32 %s1164_s15, 4  ;;  %s989_s9 = sshll.u32 %s1164_s15, 3  ;;  %s1164_s15 = sphi %s1281_s15, %s393_s15  }
  0x1f   : >> { %v507_v2 = vld [vmem:[#allocation2 + $0x2f0] sm:$0xff]  ;;  %557 = vmatpush.msra.mxu2 %v459_v1  ;;  %v504_v4 = vld [vmem:[#allocation2 + $0x2d8] sm:$0xff]  ;;  %v501_v6 = vld [vmem:[#allocation2 + $0x2c0] sm:$0xff]  ;;  %s1288_s16 = scalar_lea.vmem %s1267_s8, %s997_s24  ;;  %s411_s10 = scalar_lea.vmem %s1272_s11, %s989_s9 }
  0x20   : >> { %577 = vmatpush.msra.mxu3 %v507_v2  ;;  %v458_v7 = vld [vmem:[#allocation2 + $0x168] sm:$0xff]  ;;  %v455_v8 = vld [vmem:[#allocation2 + $0x150] sm:$0xff]  ;;  %v452_v11 = vld [vmem:[#allocation2 + $0x138] sm:$0xff]  ;;  %s801_s24 = sadd.s32 %s1164_s15, %s1260_s20  ;;  %s393_s15 = sadd.s32 1, %s1164_s15  }
  0x21   : >> { %558 = vmatpush.msra.mxu2 %v456_v3  ;;  %517 = vmatpush.msra.mxu0 %v458_v7  ;;  %v450_v9 = vld [vmem:[#allocation2 + $0x128] sm:$0xff]  ;;  %v447_v12 = vld [vmem:[#allocation2 + $0x110] sm:$0xff]  ;;  %v449_v14 = vld [vmem:[#allocation2 + $0x120] sm:$0xff]  ;;  %p1331_p9 = scmp.lt.s32.totalorder %s801_s24, 9  ;;  %p390_p10 = scmp.ge.s32.totalorder %s393_s15, 4  }
  0x22   : >> { %578 = vmatpush.msra.mxu3 %v504_v4  ;;  %v498_v10 = vld [vmem:[#allocation2 + $0x2a8] sm:$0xff]  ;;  %v495_v13 = vld [vmem:[#allocation2 + $0x290] sm:$0xff]  ;;  %v444_v15 = vld [vmem:[#allocation2 + $0xf8] sm:$0xff] }
  0x23   : >> { %559 = vmatpush.msra.mxu2 %v453_v5  ;;  %518 = vmatpush.msra.mxu0 %v455_v8  ;;  %v492_v16 = vld [vmem:[#allocation2 + $0x278] sm:$0xff]  ;;  %v446_v17 = vld [vmem:[#allocation2 + $0x108] sm:$0xff]  ;;  %v441_v18 = vld [vmem:[#allocation2 + $0xe0] sm:$0xff]  ;;  %s803_s17 = scalar_select %p1331_p9, 1, 0 }
  0x24   : >> { %579 = vmatpush.msra.mxu3 %v501_v6  ;;  %v489_v19 = vld [vmem:[#allocation2 + $0x260] sm:$0xff]  ;;  %v443_v20 = vld [vmem:[#allocation2 + $0xf0] sm:$0xff]  ;;  %v438_v21 = vld [vmem:[#allocation2 + $0xc8] sm:$0xff] }
  0x25   : >> { %560 = vmatpush.msra.mxu2 %v450_v9  ;;  %519 = vmatpush.msra.mxu0 %v452_v11  ;;  %v486_v22 = vld [vmem:[#allocation2 + $0x248] sm:$0xff]  ;;  %v440_v23 = vld [vmem:[#allocation2 + $0xd8] sm:$0xff]  ;;  %v435_v24 = vld [vmem:[#allocation2 + $0xb0] sm:$0xff]  ;;  %s804_s18 = scvt.s32.f32 %s803_s17 }
  0x26   : >> { %580 = vmatpush.msra.mxu3 %v498_v10  ;;  %v483_v25 = vld [vmem:[#allocation2 + $0x230] sm:$0xff]  ;;  %v506_v26 = vld [vmem:[#allocation2 + $0x2e8] sm:$0xff]  ;;  %v437_v27 = vld [vmem:[#allocation2 + $0xc0] sm:$0xff] }
  0x27   : >> { %561 = vmatpush.msra.mxu2 %v447_v12  ;;  %520 = vmatpush.msra.mxu0 %v449_v14  ;;  %v432_v28 = vld [vmem:[#allocation2 + $0x98] sm:$0xff]  ;;  %v503_v30 = vld [vmem:[#allocation2 + $0x2d0] sm:$0xff]  ;;  %v434_v31 = vld [vmem:[#allocation2 + $0xa8] sm:$0xff]  ;;  %s807_s19 = ssub.f32 1.0, %s804_s18 }
  0x28   : >> { %581 = vmatpush.msra.mxu3 %v495_v13  ;;  %v480_v29 = vld [vmem:[#allocation2 + $0x218] sm:$0xff]  ;;  %537 = vmatpush.msra.mxu1 %v506_v26  ;;  %v429_v33 = vld [vmem:[#allocation2 + $0x80] sm:$0xff]  ;;  %v431_v35 = vld [vmem:[#allocation2 + $0x90] sm:$0xff] }
  0x29   : >> { %562 = vmatpush.msra.mxu2 %v444_v15  ;;  %521 = vmatpush.msra.mxu0 %v446_v17  ;;  %v500_v32 = vld [vmem:[#allocation2 + $0x2b8] sm:$0xff]  ;;  %v477_v34 = vld [vmem:[#allocation2 + $0x200] sm:$0xff]  ;;  %v426_v37 = vld [vmem:[#allocation2 + $0x68] sm:$0xff] }
  0x2a   : >> { %582 = vmatpush.msra.mxu3 %v492_v16  ;;  %538 = vmatpush.msra.mxu1 %v503_v30  ;;  %v497_v36 = vld [vmem:[#allocation2 + $0x2a0] sm:$0xff]  ;;  %v474_v38 = vld [vmem:[#allocation2 + $0x1e8] sm:$0xff]  ;;  %v428_v39 = vld [vmem:[#allocation2 + $0x78] sm:$0xff] }
  0x2b   : >> { %563 = vmatpush.msra.mxu2 %v441_v18  ;;  %522 = vmatpush.msra.mxu0 %v443_v20  ;;  %v494_v40 = vld [vmem:[#allocation2 + $0x288] sm:$0xff]  ;;  %v423_v41 = vld [vmem:[#allocation2 + $0x50] sm:$0xff]  ;;  %v425_v43 = vld [vmem:[#allocation2 + $0x60] sm:$0xff] }
  0x2c   : >> { %583 = vmatpush.msra.mxu3 %v489_v19  ;;  %539 = vmatpush.msra.mxu1 %v500_v32  ;;  %v471_v42 = vld [vmem:[#allocation2 + $0x1d0] sm:$0xff]  ;;  %v420_v45 = vld [vmem:[#allocation2 + $0x38] sm:$0xff]  ;;  %v422_v47 = vld [vmem:[#allocation2 + $0x48] sm:$0xff] }
  0x2d   : >> { %564 = vmatpush.msra.mxu2 %v438_v21  ;;  %523 = vmatpush.msra.mxu0 %v440_v23  ;;  %v491_v44 = vld [vmem:[#allocation2 + $0x270] sm:$0xff]  ;;  %v468_v46 = vld [vmem:[#allocation2 + $0x1b8] sm:$0xff]  ;;  %v417_v49 = vld [vmem:[#allocation2 + $0x20] sm:$0xff] }
  0x2e   : >> { %584 = vmatpush.msra.mxu3 %v486_v22  ;;  %540 = vmatpush.msra.mxu1 %v497_v36  ;;  %v488_v48 = vld [vmem:[#allocation2 + $0x258] sm:$0xff]  ;;  %v465_v50 = vld [vmem:[#allocation2 + $0x1a0] sm:$0xff]  ;;  %v419_v51 = vld [vmem:[#allocation2 + $0x30] sm:$0xff] }
  0x2f   : >> { %565 = vmatpush.msra.mxu2 %v435_v24  ;;  %524 = vmatpush.msra.mxu0 %v437_v27  ;;  %v485_v52 = vld [vmem:[#allocation2 + $0x240] sm:$0xff]  ;;  %v414_v53 = vld [vmem:[#allocation2 + $0x8] sm:$0xff]  ;;  %v683_v56 = vld [vmem:[#allocation4 + $0x170] sm:$0xff] }
  0x30   : >> { %585 = vmatpush.msra.mxu3 %v483_v25  ;;  %541 = vmatpush.msra.mxu1 %v494_v40  ;;  %v462_v54 = vld [vmem:[#allocation2 + $0x188] sm:$0xff]  ;;  %v416_v57 = vld [vmem:[#allocation2 + $0x18] sm:$0xff]  ;;  %v679_v58 = vld [vmem:[#allocation4 + $0x150] sm:$0xff] }
  0x31   : >> { %566 = vmatpush.msra.mxu2 %v432_v28  ;;  %525 = vmatpush.msra.mxu0 %v434_v31  ;;  %v682_v55 = vld [vmem:[#allocation4 + $0x168] sm:$0xff]  ;;  %v680_v59 = vld [vmem:[#allocation4 + $0x158] sm:$0xff]  ;;  %v413_v60 = vld [vmem:[#allocation2] sm:$0xff] }
  0x32   : >> { %586 = vmatpush.msra.mxu3 %v480_v29  ;;  %542 = vmatpush.msra.mxu1 %v491_v44  ;;  %v482_v61 = vld [vmem:[#allocation2 + $0x228] sm:$0xff]  ;;  %v676_v62 = vld [vmem:[#allocation4 + $0x138] sm:$0xff]  ;;  %v677_v63 = vld [vmem:[#allocation4 + $0x140] sm:$0xff] }
  0x33   : >> { %567 = vmatpush.msra.mxu2 %v429_v33  ;;  %526 = vmatpush.msra.mxu0 %v431_v35  ;;  %v479_v0 = vld [vmem:[#allocation2 + $0x210] sm:$0xff]  ;;  %v1053_v1 = vld [vmem:[%s1359_s5] ss:$0 sm:$0xff]  ;;  %v1054_v3 = vld [vmem:[%s1359_s5 + $0x1] ss:$0 sm:$0xff] }
  0x34   : >> { %587 = vmatpush.msra.mxu3 %v477_v34  ;;  %543 = vmatpush.msra.mxu1 %v488_v48  ;;  %v1296_v2 = vld [vmem:[%s1361_s7] sm:$0xff]  ;;  %v460_v4 = vld [vmem:[#allocation2 + $0x178] sm:$0xff]  ;;  %v674_v9 = vld [vmem:[#allocation4 + $0x128] sm:$0xff] }
  0x35   : >> { %568 = vmatpush.msra.mxu2 %v426_v37  ;;  %527 = vmatpush.msra.mxu0 %v428_v39  ;;  %v476_v5 = vld [vmem:[#allocation2 + $0x1f8] sm:$0xff]  ;;  %v1302_v6 = vld [vmem:[%s1288_s16] sm:$0xff]  ;;  %v402_v7 = vmul.f32 %v1053_v1, %v1296_v2  ;;  %v670_v14 = vld [vmem:[#allocation4 + $0x108] sm:$0xff] }
  0x36   : >> { %588 = vmatpush.msra.mxu3 %v474_v38  ;;  %544 = vmatpush.msra.mxu1 %v485_v52  ;;  %v673_v8 = vld [vmem:[#allocation4 + $0x120] sm:$0xff]  ;;  %v405_v10 = vmul.f32 %v1054_v3, %v1302_v6  ;;  %v671_v15 = vld [vmem:[#allocation4 + $0x110] sm:$0xff]  ;;  %v454_v17 = vld [vmem:[#allocation2 + $0x148] sm:$0xff] }
  0x37   : >> { %569 = vmatpush.msra.mxu2 %v423_v41  ;;  %528 = vmatpush.msra.mxu0 %v425_v43  ;;  %v1055_v11 = vld [vmem:[%s1359_s5 + $0x2] ss:$0 sm:$0xff]  ;;  %v470_v18 = vld [vmem:[#allocation2 + $0x1c8] sm:$0xff]  ;;  %v667_v19 = vld [vmem:[#allocation4 + $0xf0] sm:$0xff] }
  0x38   : >> { %589 = vmatpush.msra.mxu3 %v471_v42  ;;  %545 = vmatpush.msra.mxu1 %v482_v61  ;;  %v457_v12 = vld [vmem:[#allocation2 + $0x160] sm:$0xff]  ;;  %v406_v16 = vadd.f32 %v405_v10, %v402_v7  ;;  %v668_v20 = vld [vmem:[#allocation4 + $0xf8] sm:$0xff]  ;;  %v451_v22 = vld [vmem:[#allocation2 + $0x130] sm:$0xff] }
  0x39   : >> { %570 = vmatpush.msra.mxu2 %v420_v45  ;;  %529 = vmatpush.msra.mxu0 %v422_v47  ;;  %v473_v13 = vld [vmem:[#allocation2 + $0x1e0] sm:$0xff]  ;;  %v664_v23 = vld [vmem:[#allocation4 + $0xd8] sm:$0xff]  ;;  %v1312_v26 = vld [vmem:[%s1288_s16 + $0x8] sm:$0xff] }
  0x3a   : >> { %590 = vmatpush.msra.mxu3 %v468_v46  ;;  %546 = vmatpush.msra.mxu1 %v479_v0  ;;  %v409_v21 = vadd.f32 %v1055_v11, %v406_v16  ;;  %v665_v24 = vld [vmem:[#allocation4 + $0xe0] sm:$0xff]  ;;  %v448_v25 = vld [vmem:[#allocation2 + $0x118] sm:$0xff]  ;;  %v662_v28 = vld [vmem:[#allocation4 + $0xc8] sm:$0xff] }
  0x3b   : >> { %571 = vmatpush.msra.mxu2 %v417_v49  ;;  %530 = vmatpush.msra.mxu0 %v419_v51  ;;  %v661_v27 = vld [vmem:[#allocation4 + $0xc0] sm:$0xff]  ;;  %v467_v30 = vld [vmem:[#allocation2 + $0x1b0] sm:$0xff]  ;;  %v658_v31 = vld [vmem:[#allocation4 + $0xa8] sm:$0xff] }
  0x3c   : >> { %591 = vmatpush.msra.mxu3 %v465_v50  ;;  %547 = vmatpush.msra.mxu1 %v476_v5  ;;  %412 = vst [vmem:[%s411_s10] sm:$0xff] %v409_v21  ;;  %v445_v29 = vld [vmem:[#allocation2 + $0x100] sm:$0xff]  ;;  %v659_v32 = vld [vmem:[#allocation4 + $0xb0] sm:$0xff]  ;;  %v442_v33 = vld [vmem:[#allocation2 + $0xe8] sm:$0xff] }
  0x3d   : >> { %572 = vmatpush.msra.mxu2 %v414_v53  ;;  %531 = vmatpush.msra.mxu0 %v416_v57  ;;  %v464_v34 = vld [vmem:[#allocation2 + $0x198] sm:$0xff]  ;;  %v655_v35 = vld [vmem:[#allocation4 + $0x90] sm:$0xff]  ;;  %v461_v38 = vld [vmem:[#allocation2 + $0x180] sm:$0xff] }
  0x3e   : >> { %592 = vmatpush.msra.mxu3 %v462_v54  ;;  %548 = vmatpush.msra.mxu1 %v473_v13  ;;  %v656_v36 = vld [vmem:[#allocation4 + $0x98] sm:$0xff]  ;;  %v439_v37 = vld [vmem:[#allocation2 + $0xd0] sm:$0xff]  ;;  %v653_v40 = vld [vmem:[#allocation4 + $0x80] sm:$0xff] }
  0x3f   : >> { %694 = vmatpush.msrb.mxu2 %v682_v55  ;;  %532 = vmatpush.msra.mxu0 %v413_v60  ;;  %v652_v39 = vld [vmem:[#allocation4 + $0x78] sm:$0xff]  ;;  %v649_v43 = vld [vmem:[#allocation4 + $0x60] sm:$0xff]  ;;  %v650_v44 = vld [vmem:[#allocation4 + $0x68] sm:$0xff] }
  0x40   : >> { %714 = vmatpush.msrb.mxu3 %v683_v56  ;;  %549 = vmatpush.msra.mxu1 %v470_v18  ;;  %v436_v41 = vld [vmem:[#allocation2 + $0xb8] sm:$0xff]  ;;  %v433_v45 = vld [vmem:[#allocation2 + $0xa0] sm:$0xff]  ;;  %v646_v47 = vld [vmem:[#allocation4 + $0x48] sm:$0xff] }
  0x41   : >> { %695 = vmatpush.msrb.mxu2 %v679_v58  ;;  %597 = vmatpush.msrb.mxu0 %v460_v4  ;;  %v508_v42 = vld [vmem:[#allocation2 + $0x2f8] sm:$0xff]  ;;  %v505_v46 = vld [vmem:[#allocation2 + $0x2e0] sm:$0xff]  ;;  %v647_v48 = vld [vmem:[#allocation4 + $0x50] sm:$0xff] }
  0x42   : >> { %715 = vmatpush.msrb.mxu3 %v680_v59  ;;  %573 = vmatmul.f32.vlgmr.msra.gmra.mxu2 %v1302_v6  ;;  %v430_v49 = vld [vmem:[#allocation2 + $0x88] sm:$0xff]  ;;  %v643_v51 = vld [vmem:[#allocation4 + $0x30] sm:$0xff]  ;;  %v644_v52 = vld [vmem:[#allocation4 + $0x38] sm:$0xff] }
  0x43   : >> { %696 = vmatpush.msrb.mxu2 %v676_v62  ;;  %598 = vmatpush.msrb.mxu0 %v457_v12  ;;  %v502_v50 = vld [vmem:[#allocation2 + $0x2c8] sm:$0xff]  ;;  %v427_v53 = vld [vmem:[#allocation2 + $0x70] sm:$0xff]  ;;  %v640_v55 = vld [vmem:[#allocation4 + $0x18] sm:$0xff] }
  0x44   : >> { %716 = vmatpush.msrb.mxu3 %v677_v63  ;;  %550 = vmatpush.msra.mxu1 %v467_v30  ;;  %v499_v54 = vld [vmem:[#allocation2 + $0x2b0] sm:$0xff]  ;;  %v641_v56 = vld [vmem:[#allocation4 + $0x20] sm:$0xff]  ;;  %v424_v57 = vld [vmem:[#allocation2 + $0x58] sm:$0xff] }
  0x45   : >> { %697 = vmatpush.msrb.mxu2 %v673_v8  ;;  %599 = vmatpush.msrb.mxu0 %v454_v17  ;;  %v637_v58 = vld [vmem:[#allocation4] sm:$0xff]  ;;  %v638_v59 = vld [vmem:[#allocation4 + $0x8] sm:$0xff]  ;;  %v496_v62 = vld [vmem:[#allocation2 + $0x298] sm:$0xff] }
  0x46   : >> { %717 = vmatpush.msrb.mxu3 %v674_v9  ;;  %551 = vmatpush.msra.mxu1 %v464_v34  ;;  %v421_v60 = vld [vmem:[#allocation2 + $0x40] sm:$0xff]  ;;  %v418_v61 = vld [vmem:[#allocation2 + $0x28] sm:$0xff]  ;;  %v415_v63 = vld [vmem:[#allocation2 + $0x10] sm:$0xff] }
  0x47   : >> { %698 = vmatpush.msrb.mxu2 %v670_v14  ;;  %600 = vmatpush.msrb.mxu0 %v451_v22  ;;  %v493_v0 = vld [vmem:[#allocation2 + $0x280] sm:$0xff]  ;;  %v684_v1 = vld [vmem:[#allocation4 + $0x178] sm:$0xff]  ;;  %v490_v3 = vld [vmem:[#allocation2 + $0x268] sm:$0xff] }
  0x48   : >> { %718 = vmatpush.msrb.mxu3 %v671_v15  ;;  %552 = vmatpush.msra.mxu1 %v461_v38  ;;  %v681_v4 = vld [vmem:[#allocation4 + $0x160] sm:$0xff]  ;;  %v487_v5 = vld [vmem:[#allocation2 + $0x250] sm:$0xff]  ;;  %v678_v7 = vld [vmem:[#allocation4 + $0x148] sm:$0xff] }
  0x49   : >> { %699 = vmatpush.msrb.mxu2 %v667_v19  ;;  %601 = vmatpush.msrb.mxu0 %v448_v25  ;;  %v484_v8 = vld [vmem:[#allocation2 + $0x238] sm:$0xff]  ;;  %v675_v9 = vld [vmem:[#allocation4 + $0x130] sm:$0xff]  ;;  %v481_v10 = vld [vmem:[#allocation2 + $0x220] sm:$0xff] }
  0x4a   : >> { %719 = vmatpush.msrb.mxu3 %v668_v20  ;;  %617 = vmatpush.msrb.mxu1 %v508_v42  ;;  %v672_v11 = vld [vmem:[#allocation4 + $0x118] sm:$0xff]  ;;  %v478_v12 = vld [vmem:[#allocation2 + $0x208] sm:$0xff]  ;;  %v669_v13 = vld [vmem:[#allocation4 + $0x100] sm:$0xff] }
  0x4b   : >> { %700 = vmatpush.msrb.mxu2 %v664_v23  ;;  %593 = vmatmul.f32.vlgmr.msra.gmra.mxu3 %v1312_v26  ;;  %v475_v14 = vld [vmem:[#allocation2 + $0x1f0] sm:$0xff]  ;;  %v666_v15 = vld [vmem:[#allocation4 + $0xe8] sm:$0xff]  ;;  %v472_v16 = vld [vmem:[#allocation2 + $0x1d8] sm:$0xff] }
  0x4c   : >> { %720 = vmatpush.msrb.mxu3 %v665_v24  ;;  %602 = vmatpush.msrb.mxu0 %v445_v29  ;;  %v663_v17 = vld [vmem:[#allocation4 + $0xd0] sm:$0xff]  ;;  %v469_v18 = vld [vmem:[#allocation2 + $0x1c0] sm:$0xff]  ;;  %v660_v19 = vld [vmem:[#allocation4 + $0xb8] sm:$0xff] }
  0x4d   : >> { %701 = vmatpush.msrb.mxu2 %v661_v27  ;;  %618 = vmatpush.msrb.mxu1 %v505_v46  ;;  %v466_v20 = vld [vmem:[#allocation2 + $0x1a8] sm:$0xff]  ;;  %v657_v21 = vld [vmem:[#allocation4 + $0xa0] sm:$0xff]  ;;  %v651_v23 = vld [vmem:[#allocation4 + $0x70] sm:$0xff] }
  0x4e   : >> { %721 = vmatpush.msrb.mxu3 %v662_v28  ;;  %603 = vmatpush.msrb.mxu0 %v442_v33  ;;  %v654_v22 = vld [vmem:[#allocation4 + $0x88] sm:$0xff]  ;;  %v648_v24 = vld [vmem:[#allocation4 + $0x58] sm:$0xff]  ;;  %v645_v25 = vld [vmem:[#allocation4 + $0x40] sm:$0xff] }
  0x4f   : >> { %702 = vmatpush.msrb.mxu2 %v658_v31  ;;  %619 = vmatpush.msrb.mxu1 %v502_v50  ;;  %v642_v27 = vld [vmem:[#allocation4 + $0x28] sm:$0xff]  ;;  %v639_v28 = vld [vmem:[#allocation4 + $0x10] sm:$0xff]  ;;  %v509_v30 = vld [vmem:[%s1358_s4] ss:$2 sm:$0x7] }
  0x50   : >> { %722 = vmatpush.msrb.mxu3 %v659_v32  ;;  %604 = vmatpush.msrb.mxu0 %v439_v37  ;;  %v511_v32 = vperm.slane %v509_v30, 0  ;;  %v512_v33 = vperm.slane %v509_v30, 1 }
  0x51   : >> { %703 = vmatpush.msrb.mxu2 %v655_v35  ;;  %620 = vmatpush.msrb.mxu1 %v499_v54 }
  0x52   : >> { %723 = vmatpush.msrb.mxu3 %v656_v36  ;;  %605 = vmatpush.msrb.mxu0 %v436_v41 }
  0x53   : >> { %704 = vmatpush.msrb.mxu2 %v652_v39  ;;  %553 = vmatmul.f32.vlgmr.msra.gmra.mxu1 %v1312_v26 }
  0x54   : >> { %724 = vmatpush.msrb.mxu3 %v653_v40  ;;  %606 = vmatpush.msrb.mxu0 %v433_v45 }
  0x55   : >> { %705 = vmatpush.msrb.mxu2 %v649_v43  ;;  %533 = vmatmul.f32.vlgmr.msra.gmra.mxu0 %v1302_v6 }
  0x56   : >> { %725 = vmatpush.msrb.mxu3 %v650_v44  ;;  %607 = vmatpush.msrb.mxu0 %v430_v49 }
  0x57   : >> { %706 = vmatpush.msrb.mxu2 %v646_v47  ;;  %621 = vmatpush.msrb.mxu1 %v496_v62 }
  0x58   : >> { %726 = vmatpush.msrb.mxu3 %v647_v48  ;;  %608 = vmatpush.msrb.mxu0 %v427_v53 }
  0x59   : >> { %707 = vmatpush.msrb.mxu2 %v643_v51  ;;  %622 = vmatpush.msrb.mxu1 %v493_v0 }
  0x5a   : >> { %727 = vmatpush.msrb.mxu3 %v644_v52  ;;  %609 = vmatpush.msrb.mxu0 %v424_v57 }
  0x5b   : >> { %708 = vmatpush.msrb.mxu2 %v640_v55  ;;  %623 = vmatpush.msrb.mxu1 %v490_v3 }
  0x5c   : >> { %728 = vmatpush.msrb.mxu3 %v641_v56  ;;  %610 = vmatpush.msrb.mxu0 %v421_v60 }
  0x5d   : >> { %709 = vmatpush.msrb.mxu2 %v637_v58  ;;  %624 = vmatpush.msrb.mxu1 %v487_v5 }
  0x5e   : >> { %729 = vmatpush.msrb.mxu3 %v638_v59  ;;  %710 = vmatmul.f32.vlgmr.msrb.gmra.mxu2 %v1296_v2  ;;  %v513_v59 = vperm.slane %v509_v30, 2 }
  0x5f   : >> { %730 = vmatmul.f32.vlgmr.msrb.gmra.mxu3 %v1296_v2  ;;  %611 = vmatpush.msrb.mxu0 %v418_v61 }
  0x60   : >> { %625 = vmatpush.msrb.mxu1 %v484_v8 }
  0x61   : >> { %612 = vmatpush.msrb.mxu0 %v415_v63 }
  0x62   : >> { %613 = vmatmul.f32.vlgmr.msrb.gmra.mxu0 %v1302_v6  ;;  %626 = vmatpush.msrb.mxu1 %v481_v10  ;;  %v463_v6 = vld [vmem:[#allocation2 + $0x190] sm:$0xff] }
  0x63   : >> { %734 = vmatpush.msra.mxu0 %v684_v1 }
  0x64   : >> { %627 = vmatpush.msrb.mxu1 %v478_v12 }
  0x65   : >> { %735 = vmatpush.msra.mxu0 %v681_v4 }
  0x66   : >> { %628 = vmatpush.msrb.mxu1 %v475_v14 }
  0x67   : >> { %736 = vmatpush.msra.mxu0 %v678_v7 }
  0x68   : >> { %629 = vmatpush.msrb.mxu1 %v472_v16 }
  0x69   : >> { %737 = vmatpush.msra.mxu0 %v675_v9 }
  0x6a   : >> { %630 = vmatpush.msrb.mxu1 %v469_v18 }
  0x6b   : >> { %738 = vmatpush.msra.mxu0 %v672_v11 }
  0x6c   : >> { %631 = vmatpush.msrb.mxu1 %v466_v20 }
  0x6d   : >> { %739 = vmatpush.msra.mxu0 %v669_v13 }
  0x6e   : >> { %632 = vmatpush.msrb.mxu1 %v463_v6 }
  0x6f   : >> { %740 = vmatpush.msra.mxu0 %v666_v15  ;;  %633 = vmatmul.f32.vlgmr.msrb.gmra.mxu1 %v1312_v26  ;;  %v990_v26 = vld [vmem:[%s1358_s4 + $0x1] ss:$2 sm:$0x7] }
  0x70   : >> { %v688_v37 = vperm.slane %v990_v26, 0  ;;  %v689_v39 = vperm.slane %v990_v26, 1  ;;  %v690_v63 = vperm.slane %v990_v26, 2 }
  0x71   : >> { %741 = vmatpush.msra.mxu0 %v663_v17 }
  0x73   : >> { %742 = vmatpush.msra.mxu0 %v660_v19 }
  0x75   : >> { %743 = vmatpush.msra.mxu0 %v657_v21 }
  0x77   : >> { %744 = vmatpush.msra.mxu0 %v654_v22 }
  0x79   : >> { %745 = vmatpush.msra.mxu0 %v651_v23  ;;  %v808_v23 = vstv %s807_s19 }
  0x7b   : >> { %746 = vmatpush.msra.mxu0 %v648_v24 }
  0x7d   : >> { %747 = vmatpush.msra.mxu0 %v645_v25 }
  0x7f   : >> { %748 = vmatpush.msra.mxu0 %v642_v27  ;;  %v805_v27 = vstv %s804_s18 }
  0x81   : >> { %749 = vmatpush.msra.mxu0 %v639_v28  ;;  %v809_v28 = vmul.f32 %v808_v23, %v1296_v2 }
  0x82   : >> { %750 = vmatmul.f32.vlgmr.msra.gmra.mxu0 %v1296_v2 }
  0xc5   : >> { %v574_v29 = vpop.f32.mrf.mxu2 }
  0xc6   : >> { %v575_v38 = vadd.f32 %v574_v29, %v512_v33 }
  0xce   : >> { %v594_v31 = vpop.f32.mrf.mxu3 }
  0xcf   : >> { %v595_v44 = vadd.f32 %v594_v31, %v575_v38 }
  0xd0   : >> { %v554_v36 = vpop.f32.mrf.mxu1 }
  0xd2   : >> { %v534_v34 = vpop.f32.mrf.mxu0 }
  0xd3   : >> { %v535_v35 = vadd.f32 %v534_v34, %v511_v32 }
  0xd5   : >> { %v555_v40 = vadd.f32 %v554_v36, %v535_v35 }
  0xdf   : >> { %v614_v54 = vpop.f32.mrf.mxu0 }
  0xe0   : >> { %v615_v4 = vadd.f32 %v614_v54, %v513_v59 }
  0xe1   : >> { %v711_v41 = vpop.f32.mrf.mxu2 }
  0xe2   : >> { %v712_v42 = vadd.f32 %v711_v41, %v688_v37  ;;  %v731_v43 = vpop.f32.mrf.mxu3 }
  0xe3   : >> { %v732_v45 = vadd.f32 %v731_v43, %v689_v39 }
  0xe4   : >> { %v754_v46 = vadd.f32 %v712_v42, %v555_v40 }
  0xe5   : >> { %v774_v47 = vadd.f32 %v732_v45, %v595_v44 }
  0xe6   : >> { %v991_v48 = vmul.f32 -1.442695, %v754_v46 }
  0xe7   : >> { %v992_v49 = vmul.f32 -1.442695, %v774_v47 }
  0xe8   : >> { %1056 = vpow2.f32 %v991_v48 }
  0xe9   : >> { %1058 = vpow2.f32 %v992_v49 }
  0xec   : >> { %v634_v7 = vpop.f32.mrf.mxu1 }
  0xed   : >> { %v635_v15 = vadd.f32 %v634_v7, %v615_v4 }
  0xee   : >> { %v1057_v50 = vpop.eup %1056 }
  0xef   : >> { %v1059_v51 = vpop.eup %1058  ;;  %v758_v52 = vadd.f32 1.0, %v1057_v50 }
  0xf0   : >> { %v778_v53 = vadd.f32 1.0, %v1059_v51 }
  0xf1   : >> { %1060 = vrcp.f32 %v758_v52  ;;  %v770_v62 = vand.u32 2147483648, %v758_v52  ;;  %v768_v1 = vand.u32 2147483647, %v758_v52  ;;  %vm764_vm1 = vweird.f32 %v758_v52 }
  0xf2   : >> { %1062 = vrcp.f32 %v778_v53  ;;  %v790_v14 = vand.u32 2147483648, %v778_v53  ;;  %vm784_vm5 = vweird.f32 %v778_v53  ;;  %v788_v17 = vand.u32 2147483647, %v778_v53 }
  0xf3   : >> { %v771_v9 = vor.u32 1.1754944e-38, %v770_v62  ;;  %vm769_vm3 = vcmp.eq.f32.partialorder %v768_v1, 8.507059e+37 }
  0xf4   : >> { %v791_v20 = vor.u32 1.1754944e-38, %v790_v14  ;;  %vm789_vm7 = vcmp.eq.f32.partialorder %v788_v17, 8.507059e+37 }
  0xf7   : >> { %v1061_v55 = vpop.eup %1060 }
  0xf8   : >> { %v1063_v56 = vpop.eup %1062  ;;  %v760_v57 = vmul.f32 %v1061_v55, %v758_v52  ;;  %vm765_vm0 = vweird.f32 %v1061_v55 }
  0xf9   : >> { %v780_v58 = vmul.f32 %v1063_v56, %v778_v53  ;;  %vm766_vm2 = vmor %vm764_vm1, %vm765_vm0  ;;  %vm785_vm4 = vweird.f32 %v1063_v56 }
  0xfa   : >> { %v761_v60 = vsub.f32 1.0, %v760_v57  ;;  %vm786_vm6 = vmor %vm784_vm5, %vm785_vm4 }
  0xfb   : >> { %v781_v61 = vsub.f32 1.0, %v780_v58 }
  0xfc   : >> { %v762_v0 = vmul.f32 %v1061_v55, %v761_v60 }
  0xfd   : >> { %v782_v3 = vmul.f32 %v1063_v56, %v781_v61 }
  0xfe   : >> { %v763_v5 = vadd.f32 %v1061_v55, %v762_v0 }
  0xff   : >> { %v751_v8 = vpop.f32.mrf.mxu0  ;;  %v783_v13 = vadd.f32 %v1063_v56, %v782_v3 }
 0x100   : >> { %v752_v10 = vadd.f32 %v751_v8, %v690_v63  ;;  %v767_v11 = vsel %vm766_vm2, %v1061_v55, %v763_v5 }
 0x101   : >> { %v772_v12 = vsel %vm769_vm3, %v771_v9, %v767_v11  ;;  %v787_v19 = vsel %vm786_vm6, %v1063_v56, %v783_v13 }
 0x102   : >> { %v794_v16 = vmul.f32 %v772_v12, %v752_v10  ;;  %v792_v21 = vsel %vm789_vm7, %v791_v20, %v787_v19 }
 0x103   : >> { %v797_v6 = vsub.f32 1.0, %v792_v21  ;;  %v799_v25 = vmul.f32 %v792_v21, %v1296_v2 }
 0x104   : >> { %v795_v18 = vadd.f32 %v794_v16, %v635_v15 }
 0x106   : >> { %1064 = vtanh.f32 %v795_v18 }
 0x10c   : >> { %v1065_v22 = vpop.eup %1064 }
 0x10d   : >> { %v798_v24 = vmul.f32 %v1065_v22, %v797_v6 }
 0x10f   : >> { %v800_v29 = vadd.f32 %v799_v25, %v798_v24 }
 0x111   : >> { %v806_v30 = vmul.f32 %v805_v27, %v800_v29  ;;  %392 = sbr.rel (!%p390_p10) target bundleno = 30 (0x1e), region = 112 }
 0x113   : >> { %v810_v31 = vadd.f32 %v809_v28, %v806_v30 }
 0x115   : >> { %811 = vst [vmem:[%s1361_s7] sm:$0xff] %v810_v31 }
 0x116 PF: > { %s20_s26 = sadd.s32 1, %s1160_s26   ;;  %s1365_s24 = smov %s1156_s25 }
 0x117   : > { %p17_p11 = scmp.ge.s32.totalorder %s20_s26, 5   ;;  %s1366_s25 = smov %s1368_s28 }
 0x119   :  { %19 = sbr.rel (!%p17_p11) target bundleno = 3 (0x3), region = 123 }
 0x11e   :  { %854 = vsyncpa [#allocation3], 1 }
 0x11f   :  { %856 = vsyncpa [#allocation3 + $0x1], 1 }
 0x120   :  { %857 = vsyncpa [#allocation5], 1 }

</bundles_post_ra>
